<compile_context>
chip_gen: v7x
topology: tpu7x:2x2x1
jax: 0.10.0
libtpu: 0.0.40
codegen_flags: <defaults>
</compile_context>

<pallas_src>
import functools

import jax
import jax.numpy as jnp
from jax.experimental import pallas as pl
from jax.experimental.pallas import tpu as pltpu


def _fused_model_kernel(x_ref, w_c_ref, b_in_ref, w1_ref, b_sq_ref, m_ref,
                        o_ref, *, H, W):
    """Fused input_conv + up4(Squash) for one image.

    x_ref:    (1, 9, H*W)   image, channels on sublanes, pixels on lanes
    w_c_ref:  (9, 17, 9)    per-tap stacked weight: rows 0:8  = input_conv  (Cout=8, Cin=9)
                                                    rows 8:17 = Squash-x0   (Cout=9, Cin=9)
    b_in_ref: (8, 1)
    w1_ref:   (9, 9, 8)     Squash weight acting on the x1 channels, (tap, Cout, Cin)
    b_sq_ref: (9, 1)
    m_ref:    (9, 1, H*W)   per-tap validity masks (1 inside, 0 where the window hits the halo)
    o_ref:    (1, 9, H*W)
    """
    HW = H * W
    f32 = jnp.float32
    x0 = x_ref[0]                                            # (9, HW)

    c1 = b_in_ref.shape[0]                                   # 8
    c2 = b_sq_ref.shape[0]                                   # 9

    taps = [(kh - 1, kw - 1) for kh in range(3) for kw in range(3)]
    dot = functools.partial(
        jax.lax.dot_general,
        dimension_numbers=(((1,), (0,)), ((), ())),
        preferred_element_type=f32)

    def tap_input(xf, t, dh, dw):
        # Column p of the result holds xf[:, p + dh*W + dw] (the shifted tap), zeroed
        # wherever the 3x3 window falls outside the image (the implicit zero padding).
        s = dh * W + dw
        if s == 0:
            return xf
        xs = pltpu.roll(xf, shift=(-s) % HW, axis=1)
        return xs * m_ref[t]                                 # (1, HW) mask, sublane-broadcast

    # ---- pass 1: one stacked dot per tap feeds both accumulators ------------
    #   acc1 = conv3x3(x0, w_in)          (pre-bias / pre-ReLU x1)
    #   acc2 = conv3x3(x0, w_sq[:, :9])   (x0 part of the Squash conv)
    acc1 = jnp.zeros((c1, HW), f32)                          # (8, HW)
    acc2 = jnp.zeros((c2, HW), f32)                          # (9, HW)
    for t, (dh, dw) in enumerate(taps):
        y = dot(w_c_ref[t], tap_input(x0, t, dh, dw))        # (17, HW)
        acc1 = acc1 + y[:c1]                                 # sublane-tile aligned split
        acc2 = acc2 + y[c1:]
    x1 = jnp.maximum(acc1 + b_in_ref[...], 0.0)              # (8, HW)

    # ---- pass 2: add the x1 part of the Squash conv --------------------------
    for t, (dh, dw) in enumerate(taps):
        acc2 = acc2 + dot(w1_ref[t], tap_input(x1, t, dh, dw))
    out = jnp.maximum(acc2 + b_sq_ref[...], 0.0)             # (9, HW)

    o_ref[0] = out.astype(o_ref.dtype)


def model_forward(x_nchw, params):
    """Model.forward: (N, 9, H, W) -> (N, 9, H, W), NCHW like PyTorch."""
    n, c, h, w = x_nchw.shape
    hw = h * w
    x = x_nchw.reshape(n, c, hw)                             # free contiguous reshape

    # Weight prep (tiny, data independent): (3,3,Cin,Cout) -> (tap, Cout, Cin).
    c_in1, c_out1 = params["w_in"].shape[2], params["w_in"].shape[3]      # 9, 8
    c_out2 = params["w_sq"].shape[3]                                      # 9
    w_in_t = jnp.transpose(params["w_in"].reshape(9, c_in1, c_out1), (0, 2, 1))   # (9,8,9)
    w_sq_t = params["w_sq"].reshape(9, c_in1 + c_out1, c_out2)                    # (9,17,9)
    # TODO(synk): Squash(17,9) assumed to be Conv2d(17->9,3,pad=1)+ReLU on cat([x0, x1])
    #             with x0's 9 channels first (matches the previous implementation).
    w_sq0_t = jnp.transpose(w_sq_t[:, :c_in1, :], (0, 2, 1))                      # (9,9,9)
    w_sq1_t = jnp.transpose(w_sq_t[:, c_in1:, :], (0, 2, 1))                      # (9,9,8)
    # Stack input_conv and Squash-x0 weights per tap: one MXU dot feeds both convs.
    w_comb = jnp.concatenate([w_in_t, w_sq0_t], axis=1)                           # (9,17,9)
    b_in = params["b_in"].reshape(c_out1, 1)
    b_sq = params["b_sq"].reshape(c_out2, 1)

    # Per-tap validity masks encoding the implicit 'same' zero padding: (9, 1, H*W).
    hh = jnp.arange(h)[:, None]
    ww = jnp.arange(w)[None, :]
    masks = []
    for kh in range(3):
        for kw in range(3):
            dh, dw = kh - 1, kw - 1
            valid = ((hh + dh >= 0) & (hh + dh < h) &
                     (ww + dw >= 0) & (ww + dw < w))                      # (H, W)
            masks.append(valid.reshape(1, hw))
    tap_masks = jnp.stack(masks, axis=0).astype(x.dtype)                  # (9, 1, HW)

    kernel = functools.partial(_fused_model_kernel, H=h, W=w)
    out = pl.pallas_call(
        kernel,
        out_shape=jax.ShapeDtypeStruct((n, c_out2, hw), x.dtype),
        grid_spec=pltpu.PrefetchScalarGridSpec(
            num_scalar_prefetch=0,
            grid=(n,),
            in_specs=[
                pl.BlockSpec((1, c, hw), lambda i: (i, 0, 0)),                  # x
                pl.BlockSpec((9, c_out1 + c_out2, c_in1), lambda i: (0, 0, 0)), # stacked w
                pl.BlockSpec((c_out1, 1), lambda i: (0, 0)),                    # b_in
                pl.BlockSpec((9, c_out2, c_out1), lambda i: (0, 0, 0)),         # w_sq (x1 part)
                pl.BlockSpec((c_out2, 1), lambda i: (0, 0)),                    # b_sq
                pl.BlockSpec((9, 1, hw), lambda i: (0, 0, 0)),                  # tap masks
            ],
            out_specs=pl.BlockSpec((1, c_out2, hw), lambda i: (i, 0, 0)),
        ),
        compiler_params=pltpu.CompilerParams(
            dimension_semantics=("parallel",)),
    )(x, w_comb, b_in, w_sq1_t, b_sq, tap_masks)

    return out.reshape(n, c_out2, h, w)


def init_params(dtype=jnp.float32):
    """Deterministic parameter init (shapes from the module's __init__)."""
    key = jax.random.PRNGKey(42)
    k1, k2, k3, k4 = jax.random.split(key, 4)
    # input_conv: Conv2d(9 -> 8, 3x3)
    w_in = jax.random.normal(k1, (3, 3, 9, 8), dtype) * 0.1
    b_in = jax.random.normal(k2, (8,), dtype) * 0.1
    # up4 = Squash(17, 9): Conv2d(17 -> 9, 3x3) applied to cat([x0, x1], channel)
    w_sq = jax.random.normal(k3, (3, 3, 17, 9), dtype) * 0.1
    b_sq = jax.random.normal(k4, (9,), dtype) * 0.1
    return {"w_in": w_in, "b_in": b_in, "w_sq": w_sq, "b_sq": b_sq}


def _reference_forward(x, params):
    """Plain-XLA reference of the same (live) forward graph, for a numeric cross-check."""
    dn = ("NCHW", "HWIO", "NCHW")
    x1 = jax.lax.conv_general_dilated(
        x, params["w_in"], (1, 1), "SAME", dimension_numbers=dn,
        precision=jax.lax.Precision.HIGHEST)
    x1 = jnp.maximum(x1 + params["b_in"][None, :, None, None], 0.0)
    cat = jnp.concatenate([x, x1], axis=1)
    y = jax.lax.conv_general_dilated(
        cat, params["w_sq"], (1, 1), "SAME", dimension_numbers=dn,
        precision=jax.lax.Precision.HIGHEST)
    return jnp.maximum(y + params["b_sq"][None, :, None, None], 0.0)


if __name__ == "__main__":
    N, C, H, W = 2, 9, 16, 16
    x = jax.random.normal(jax.random.PRNGKey(0), (N, C, H, W), jnp.float32)
    params = init_params()

    fwd = jax.jit(model_forward)
    y = jax.block_until_ready(fwd(x, params))

    assert y.shape == (N, 9, H, W), y.shape
    assert bool(jnp.all(jnp.isfinite(y)))

    y_ref = jax.block_until_ready(_reference_forward(x, params))
    assert bool(jnp.allclose(y, y_ref, atol=5e-2, rtol=5e-2)), \
        float(jnp.max(jnp.abs(y - y_ref)))

    print("KERNEL_OK")
</pallas_src>

<mosaic_0001>
module attributes {stable_mosaic.version = 11 : i64} {
  func.func @_fused_model_kernel(%arg0: i32, %arg1: memref<1x9x256xf32, #tpu.memory_space<vmem>>, %arg2: memref<9x17x9xf32, #tpu.memory_space<vmem>>, %arg3: memref<8x1xf32, #tpu.memory_space<vmem>>, %arg4: memref<9x9x8xf32, #tpu.memory_space<vmem>>, %arg5: memref<9x1xf32, #tpu.memory_space<vmem>>, %arg6: memref<9x1x256xf32, #tpu.memory_space<vmem>>, %arg7: memref<1x9x256xf32, #tpu.memory_space<vmem>>) attributes {dimension_semantics = [#tpu.dimension_semantics<parallel>], iteration_bounds = array<i64: 2>, scalar_prefetch = 0 : i64, scratch_operands = 0 : i64, tpu.core_type = #tpu.core_type<tc>, window_params = [{transform_indices = @transform_0, window_bounds = array<i64: 1, 9, 256>}, {pipeline_mode = #tpu.pipeline_mode<synchronous>, transform_indices = @transform_1, window_bounds = array<i64: 9, 17, 9>}, {pipeline_mode = #tpu.pipeline_mode<synchronous>, transform_indices = @transform_2, window_bounds = array<i64: 8, 1>}, {pipeline_mode = #tpu.pipeline_mode<synchronous>, transform_indices = @transform_3, window_bounds = array<i64: 9, 9, 8>}, {pipeline_mode = #tpu.pipeline_mode<synchronous>, transform_indices = @transform_4, window_bounds = array<i64: 9, 1>}, {pipeline_mode = #tpu.pipeline_mode<synchronous>, transform_indices = @transform_5, window_bounds = array<i64: 9, 1, 256>}, {transform_indices = @transform_6, window_bounds = array<i64: 1, 9, 256>}]} {
    %c0 = arith.constant 0 : index
    %c0_0 = arith.constant 0 : index
    %c0_1 = arith.constant 0 : index
    %0 = vector.load %arg1[%c0, %c0_0, %c0_1] : memref<1x9x256xf32, #tpu.memory_space<vmem>>, vector<1x9x256xf32>
    %1 = vector.shape_cast %0 : vector<1x9x256xf32> to vector<9x256xf32>
    %cst = arith.constant 0.000000e+00 : f32
    %2 = vector.broadcast %cst : f32 to vector<8x256xf32>
    %cst_2 = arith.constant 0.000000e+00 : f32
    %3 = vector.broadcast %cst_2 : f32 to vector<9x256xf32>
    %c0_3 = arith.constant 0 : index
    %c0_4 = arith.constant 0 : index
    %c0_5 = arith.constant 0 : index
    %4 = vector.load %arg2[%c0_3, %c0_4, %c0_5] : memref<9x17x9xf32, #tpu.memory_space<vmem>>, vector<1x17x9xf32>
    %5 = vector.shape_cast %4 : vector<1x17x9xf32> to vector<17x9xf32>
    %c17_i32 = arith.constant 17 : i32
    %6 = tpu.dynamic_rotate %1 by %c17_i32 dim 1 : vector<9x256xf32>, i32 -> vector<9x256xf32>
    %c0_6 = arith.constant 0 : index
    %c0_7 = arith.constant 0 : index
    %c0_8 = arith.constant 0 : index
    %7 = vector.load %arg6[%c0_6, %c0_7, %c0_8] : memref<9x1x256xf32, #tpu.memory_space<vmem>>, vector<1x1x256xf32>
    %8 = vector.shape_cast %7 : vector<1x1x256xf32> to vector<1x256xf32>
    %9 = vector.broadcast %8 : vector<1x256xf32> to vector<9x256xf32>
    %10 = arith.mulf %6, %9 : vector<9x256xf32>
    %cst_9 = arith.constant dense<0.000000e+00> : vector<17x256xf32>
    %11 = tpu.matmul %5, %10, %cst_9 {dimension_numbers = #tpu.dot_dimension_numbers<[1], [0], [0], [1], [0, 0, 1, 1], [], []>} : vector<17x9xf32>, vector<9x256xf32>, vector<17x256xf32> -> vector<17x256xf32>
    %12 = vector.extract_strided_slice %11 {offsets = [0, 0], sizes = [8, 256], strides = [1, 1]} : vector<17x256xf32> to vector<8x256xf32>
    %13 = arith.addf %2, %12 : vector<8x256xf32>
    %14 = vector.extract_strided_slice %11 {offsets = [8, 0], sizes = [9, 256], strides = [1, 1]} : vector<17x256xf32> to vector<9x256xf32>
    %15 = arith.addf %3, %14 : vector<9x256xf32>
    %c1 = arith.constant 1 : index
    %c0_10 = arith.constant 0 : index
    %c0_11 = arith.constant 0 : index
    %16 = vector.load %arg2[%c1, %c0_10, %c0_11] : memref<9x17x9xf32, #tpu.memory_space<vmem>>, vector<1x17x9xf32>
    %17 = vector.shape_cast %16 : vector<1x17x9xf32> to vector<17x9xf32>
    %c16_i32 = arith.constant 16 : i32
    %18 = tpu.dynamic_rotate %1 by %c16_i32 dim 1 : vector<9x256xf32>, i32 -> vector<9x256xf32>
    %c1_12 = arith.constant 1 : index
    %c0_13 = arith.constant 0 : index
    %c0_14 = arith.constant 0 : index
    %19 = vector.load %arg6[%c1_12, %c0_13, %c0_14] : memref<9x1x256xf32, #tpu.memory_space<vmem>>, vector<1x1x256xf32>
    %20 = vector.shape_cast %19 : vector<1x1x256xf32> to vector<1x256xf32>
    %21 = vector.broadcast %20 : vector<1x256xf32> to vector<9x256xf32>
    %22 = arith.mulf %18, %21 : vector<9x256xf32>
    %cst_15 = arith.constant dense<0.000000e+00> : vector<17x256xf32>
    %23 = tpu.matmul %17, %22, %cst_15 {dimension_numbers = #tpu.dot_dimension_numbers<[1], [0], [0], [1], [0, 0, 1, 1], [], []>} : vector<17x9xf32>, vector<9x256xf32>, vector<17x256xf32> -> vector<17x256xf32>
    %24 = vector.extract_strided_slice %23 {offsets = [0, 0], sizes = [8, 256], strides = [1, 1]} : vector<17x256xf32> to vector<8x256xf32>
    %25 = arith.addf %13, %24 : vector<8x256xf32>
    %26 = vector.extract_strided_slice %23 {offsets = [8, 0], sizes = [9, 256], strides = [1, 1]} : vector<17x256xf32> to vector<9x256xf32>
    %27 = arith.addf %15, %26 : vector<9x256xf32>
    %c2 = arith.constant 2 : index
    %c0_16 = arith.constant 0 : index
    %c0_17 = arith.constant 0 : index
    %28 = vector.load %arg2[%c2, %c0_16, %c0_17] : memref<9x17x9xf32, #tpu.memory_space<vmem>>, vector<1x17x9xf32>
    %29 = vector.shape_cast %28 : vector<1x17x9xf32> to vector<17x9xf32>
    %c15_i32 = arith.constant 15 : i32
    %30 = tpu.dynamic_rotate %1 by %c15_i32 dim 1 : vector<9x256xf32>, i32 -> vector<9x256xf32>
    %c2_18 = arith.constant 2 : index
    %c0_19 = arith.constant 0 : index
    %c0_20 = arith.constant 0 : index
    %31 = vector.load %arg6[%c2_18, %c0_19, %c0_20] : memref<9x1x256xf32, #tpu.memory_space<vmem>>, vector<1x1x256xf32>
    %32 = vector.shape_cast %31 : vector<1x1x256xf32> to vector<1x256xf32>
    %33 = vector.broadcast %32 : vector<1x256xf32> to vector<9x256xf32>
    %34 = arith.mulf %30, %33 : vector<9x256xf32>
    %cst_21 = arith.constant dense<0.000000e+00> : vector<17x256xf32>
    %35 = tpu.matmul %29, %34, %cst_21 {dimension_numbers = #tpu.dot_dimension_numbers<[1], [0], [0], [1], [0, 0, 1, 1], [], []>} : vector<17x9xf32>, vector<9x256xf32>, vector<17x256xf32> -> vector<17x256xf32>
    %36 = vector.extract_strided_slice %35 {offsets = [0, 0], sizes = [8, 256], strides = [1, 1]} : vector<17x256xf32> to vector<8x256xf32>
    %37 = arith.addf %25, %36 : vector<8x256xf32>
    %38 = vector.extract_strided_slice %35 {offsets = [8, 0], sizes = [9, 256], strides = [1, 1]} : vector<17x256xf32> to vector<9x256xf32>
    %39 = arith.addf %27, %38 : vector<9x256xf32>
    %c3 = arith.constant 3 : index
    %c0_22 = arith.constant 0 : index
    %c0_23 = arith.constant 0 : index
    %40 = vector.load %arg2[%c3, %c0_22, %c0_23] : memref<9x17x9xf32, #tpu.memory_space<vmem>>, vector<1x17x9xf32>
    %41 = vector.shape_cast %40 : vector<1x17x9xf32> to vector<17x9xf32>
    %c1_i32 = arith.constant 1 : i32
    %42 = tpu.dynamic_rotate %1 by %c1_i32 dim 1 : vector<9x256xf32>, i32 -> vector<9x256xf32>
    %c3_24 = arith.constant 3 : index
    %c0_25 = arith.constant 0 : index
    %c0_26 = arith.constant 0 : index
    %43 = vector.load %arg6[%c3_24, %c0_25, %c0_26] : memref<9x1x256xf32, #tpu.memory_space<vmem>>, vector<1x1x256xf32>
    %44 = vector.shape_cast %43 : vector<1x1x256xf32> to vector<1x256xf32>
    %45 = vector.broadcast %44 : vector<1x256xf32> to vector<9x256xf32>
    %46 = arith.mulf %42, %45 : vector<9x256xf32>
    %cst_27 = arith.constant dense<0.000000e+00> : vector<17x256xf32>
    %47 = tpu.matmul %41, %46, %cst_27 {dimension_numbers = #tpu.dot_dimension_numbers<[1], [0], [0], [1], [0, 0, 1, 1], [], []>} : vector<17x9xf32>, vector<9x256xf32>, vector<17x256xf32> -> vector<17x256xf32>
    %48 = vector.extract_strided_slice %47 {offsets = [0, 0], sizes = [8, 256], strides = [1, 1]} : vector<17x256xf32> to vector<8x256xf32>
    %49 = arith.addf %37, %48 : vector<8x256xf32>
    %50 = vector.extract_strided_slice %47 {offsets = [8, 0], sizes = [9, 256], strides = [1, 1]} : vector<17x256xf32> to vector<9x256xf32>
    %51 = arith.addf %39, %50 : vector<9x256xf32>
    %c4 = arith.constant 4 : index
    %c0_28 = arith.constant 0 : index
    %c0_29 = arith.constant 0 : index
    %52 = vector.load %arg2[%c4, %c0_28, %c0_29] : memref<9x17x9xf32, #tpu.memory_space<vmem>>, vector<1x17x9xf32>
    %53 = vector.shape_cast %52 : vector<1x17x9xf32> to vector<17x9xf32>
    %cst_30 = arith.constant dense<0.000000e+00> : vector<17x256xf32>
    %54 = tpu.matmul %53, %1, %cst_30 {dimension_numbers = #tpu.dot_dimension_numbers<[1], [0], [0], [1], [0, 0, 1, 1], [], []>} : vector<17x9xf32>, vector<9x256xf32>, vector<17x256xf32> -> vector<17x256xf32>
    %55 = vector.extract_strided_slice %54 {offsets = [0, 0], sizes = [8, 256], strides = [1, 1]} : vector<17x256xf32> to vector<8x256xf32>
    %56 = arith.addf %49, %55 : vector<8x256xf32>
    %57 = vector.extract_strided_slice %54 {offsets = [8, 0], sizes = [9, 256], strides = [1, 1]} : vector<17x256xf32> to vector<9x256xf32>
    %58 = arith.addf %51, %57 : vector<9x256xf32>
    %c5 = arith.constant 5 : index
    %c0_31 = arith.constant 0 : index
    %c0_32 = arith.constant 0 : index
    %59 = vector.load %arg2[%c5, %c0_31, %c0_32] : memref<9x17x9xf32, #tpu.memory_space<vmem>>, vector<1x17x9xf32>
    %60 = vector.shape_cast %59 : vector<1x17x9xf32> to vector<17x9xf32>
    %c255_i32 = arith.constant 255 : i32
    %61 = tpu.dynamic_rotate %1 by %c255_i32 dim 1 : vector<9x256xf32>, i32 -> vector<9x256xf32>
    %c5_33 = arith.constant 5 : index
    %c0_34 = arith.constant 0 : index
    %c0_35 = arith.constant 0 : index
    %62 = vector.load %arg6[%c5_33, %c0_34, %c0_35] : memref<9x1x256xf32, #tpu.memory_space<vmem>>, vector<1x1x256xf32>
    %63 = vector.shape_cast %62 : vector<1x1x256xf32> to vector<1x256xf32>
    %64 = vector.broadcast %63 : vector<1x256xf32> to vector<9x256xf32>
    %65 = arith.mulf %61, %64 : vector<9x256xf32>
    %cst_36 = arith.constant dense<0.000000e+00> : vector<17x256xf32>
    %66 = tpu.matmul %60, %65, %cst_36 {dimension_numbers = #tpu.dot_dimension_numbers<[1], [0], [0], [1], [0, 0, 1, 1], [], []>} : vector<17x9xf32>, vector<9x256xf32>, vector<17x256xf32> -> vector<17x256xf32>
    %67 = vector.extract_strided_slice %66 {offsets = [0, 0], sizes = [8, 256], strides = [1, 1]} : vector<17x256xf32> to vector<8x256xf32>
    %68 = arith.addf %56, %67 : vector<8x256xf32>
    %69 = vector.extract_strided_slice %66 {offsets = [8, 0], sizes = [9, 256], strides = [1, 1]} : vector<17x256xf32> to vector<9x256xf32>
    %70 = arith.addf %58, %69 : vector<9x256xf32>
    %c6 = arith.constant 6 : index
    %c0_37 = arith.constant 0 : index
    %c0_38 = arith.constant 0 : index
    %71 = vector.load %arg2[%c6, %c0_37, %c0_38] : memref<9x17x9xf32, #tpu.memory_space<vmem>>, vector<1x17x9xf32>
    %72 = vector.shape_cast %71 : vector<1x17x9xf32> to vector<17x9xf32>
    %c241_i32 = arith.constant 241 : i32
    %73 = tpu.dynamic_rotate %1 by %c241_i32 dim 1 : vector<9x256xf32>, i32 -> vector<9x256xf32>
    %c6_39 = arith.constant 6 : index
    %c0_40 = arith.constant 0 : index
    %c0_41 = arith.constant 0 : index
    %74 = vector.load %arg6[%c6_39, %c0_40, %c0_41] : memref<9x1x256xf32, #tpu.memory_space<vmem>>, vector<1x1x256xf32>
    %75 = vector.shape_cast %74 : vector<1x1x256xf32> to vector<1x256xf32>
    %76 = vector.broadcast %75 : vector<1x256xf32> to vector<9x256xf32>
    %77 = arith.mulf %73, %76 : vector<9x256xf32>
    %cst_42 = arith.constant dense<0.000000e+00> : vector<17x256xf32>
    %78 = tpu.matmul %72, %77, %cst_42 {dimension_numbers = #tpu.dot_dimension_numbers<[1], [0], [0], [1], [0, 0, 1, 1], [], []>} : vector<17x9xf32>, vector<9x256xf32>, vector<17x256xf32> -> vector<17x256xf32>
    %79 = vector.extract_strided_slice %78 {offsets = [0, 0], sizes = [8, 256], strides = [1, 1]} : vector<17x256xf32> to vector<8x256xf32>
    %80 = arith.addf %68, %79 : vector<8x256xf32>
    %81 = vector.extract_strided_slice %78 {offsets = [8, 0], sizes = [9, 256], strides = [1, 1]} : vector<17x256xf32> to vector<9x256xf32>
    %82 = arith.addf %70, %81 : vector<9x256xf32>
    %c7 = arith.constant 7 : index
    %c0_43 = arith.constant 0 : index
    %c0_44 = arith.constant 0 : index
    %83 = vector.load %arg2[%c7, %c0_43, %c0_44] : memref<9x17x9xf32, #tpu.memory_space<vmem>>, vector<1x17x9xf32>
    %84 = vector.shape_cast %83 : vector<1x17x9xf32> to vector<17x9xf32>
    %c240_i32 = arith.constant 240 : i32
    %85 = tpu.dynamic_rotate %1 by %c240_i32 dim 1 : vector<9x256xf32>, i32 -> vector<9x256xf32>
    %c7_45 = arith.constant 7 : index
    %c0_46 = arith.constant 0 : index
    %c0_47 = arith.constant 0 : index
    %86 = vector.load %arg6[%c7_45, %c0_46, %c0_47] : memref<9x1x256xf32, #tpu.memory_space<vmem>>, vector<1x1x256xf32>
    %87 = vector.shape_cast %86 : vector<1x1x256xf32> to vector<1x256xf32>
    %88 = vector.broadcast %87 : vector<1x256xf32> to vector<9x256xf32>
    %89 = arith.mulf %85, %88 : vector<9x256xf32>
    %cst_48 = arith.constant dense<0.000000e+00> : vector<17x256xf32>
    %90 = tpu.matmul %84, %89, %cst_48 {dimension_numbers = #tpu.dot_dimension_numbers<[1], [0], [0], [1], [0, 0, 1, 1], [], []>} : vector<17x9xf32>, vector<9x256xf32>, vector<17x256xf32> -> vector<17x256xf32>
    %91 = vector.extract_strided_slice %90 {offsets = [0, 0], sizes = [8, 256], strides = [1, 1]} : vector<17x256xf32> to vector<8x256xf32>
    %92 = arith.addf %80, %91 : vector<8x256xf32>
    %93 = vector.extract_strided_slice %90 {offsets = [8, 0], sizes = [9, 256], strides = [1, 1]} : vector<17x256xf32> to vector<9x256xf32>
    %94 = arith.addf %82, %93 : vector<9x256xf32>
    %c8 = arith.constant 8 : index
    %c0_49 = arith.constant 0 : index
    %c0_50 = arith.constant 0 : index
    %95 = vector.load %arg2[%c8, %c0_49, %c0_50] : memref<9x17x9xf32, #tpu.memory_space<vmem>>, vector<1x17x9xf32>
    %96 = vector.shape_cast %95 : vector<1x17x9xf32> to vector<17x9xf32>
    %c239_i32 = arith.constant 239 : i32
    %97 = tpu.dynamic_rotate %1 by %c239_i32 dim 1 : vector<9x256xf32>, i32 -> vector<9x256xf32>
    %c8_51 = arith.constant 8 : index
    %c0_52 = arith.constant 0 : index
    %c0_53 = arith.constant 0 : index
    %98 = vector.load %arg6[%c8_51, %c0_52, %c0_53] : memref<9x1x256xf32, #tpu.memory_space<vmem>>, vector<1x1x256xf32>
    %99 = vector.shape_cast %98 : vector<1x1x256xf32> to vector<1x256xf32>
    %100 = vector.broadcast %99 : vector<1x256xf32> to vector<9x256xf32>
    %101 = arith.mulf %97, %100 : vector<9x256xf32>
    %cst_54 = arith.constant dense<0.000000e+00> : vector<17x256xf32>
    %102 = tpu.matmul %96, %101, %cst_54 {dimension_numbers = #tpu.dot_dimension_numbers<[1], [0], [0], [1], [0, 0, 1, 1], [], []>} : vector<17x9xf32>, vector<9x256xf32>, vector<17x256xf32> -> vector<17x256xf32>
    %103 = vector.extract_strided_slice %102 {offsets = [0, 0], sizes = [8, 256], strides = [1, 1]} : vector<17x256xf32> to vector<8x256xf32>
    %104 = arith.addf %92, %103 : vector<8x256xf32>
    %105 = vector.extract_strided_slice %102 {offsets = [8, 0], sizes = [9, 256], strides = [1, 1]} : vector<17x256xf32> to vector<9x256xf32>
    %106 = arith.addf %94, %105 : vector<9x256xf32>
    %c0_55 = arith.constant 0 : index
    %c0_56 = arith.constant 0 : index
    %107 = vector.load %arg3[%c0_55, %c0_56] : memref<8x1xf32, #tpu.memory_space<vmem>>, vector<8x1xf32>
    %108 = vector.broadcast %107 : vector<8x1xf32> to vector<8x256xf32>
    %109 = arith.addf %104, %108 : vector<8x256xf32>
    %cst_57 = arith.constant 0.000000e+00 : f32
    %110 = vector.broadcast %cst_57 : f32 to vector<8x256xf32>
    %111 = arith.maximumf %109, %110 : vector<8x256xf32>
    %c0_58 = arith.constant 0 : index
    %c0_59 = arith.constant 0 : index
    %c0_60 = arith.constant 0 : index
    %112 = vector.load %arg4[%c0_58, %c0_59, %c0_60] : memref<9x9x8xf32, #tpu.memory_space<vmem>>, vector<1x9x8xf32>
    %113 = vector.shape_cast %112 : vector<1x9x8xf32> to vector<9x8xf32>
    %c17_i32_61 = arith.constant 17 : i32
    %114 = tpu.dynamic_rotate %111 by %c17_i32_61 dim 1 : vector<8x256xf32>, i32 -> vector<8x256xf32>
    %c0_62 = arith.constant 0 : index
    %c0_63 = arith.constant 0 : index
    %c0_64 = arith.constant 0 : index
    %115 = vector.load %arg6[%c0_62, %c0_63, %c0_64] : memref<9x1x256xf32, #tpu.memory_space<vmem>>, vector<1x1x256xf32>
    %116 = vector.shape_cast %115 : vector<1x1x256xf32> to vector<1x256xf32>
    %117 = vector.broadcast %116 : vector<1x256xf32> to vector<8x256xf32>
    %118 = arith.mulf %114, %117 : vector<8x256xf32>
    %cst_65 = arith.constant dense<0.000000e+00> : vector<9x256xf32>
    %119 = tpu.matmul %113, %118, %cst_65 {dimension_numbers = #tpu.dot_dimension_numbers<[1], [0], [0], [1], [0, 0, 1, 1], [], []>} : vector<9x8xf32>, vector<8x256xf32>, vector<9x256xf32> -> vector<9x256xf32>
    %120 = arith.addf %106, %119 : vector<9x256xf32>
    %c1_66 = arith.constant 1 : index
    %c0_67 = arith.constant 0 : index
    %c0_68 = arith.constant 0 : index
    %121 = vector.load %arg4[%c1_66, %c0_67, %c0_68] : memref<9x9x8xf32, #tpu.memory_space<vmem>>, vector<1x9x8xf32>
    %122 = vector.shape_cast %121 : vector<1x9x8xf32> to vector<9x8xf32>
    %c16_i32_69 = arith.constant 16 : i32
    %123 = tpu.dynamic_rotate %111 by %c16_i32_69 dim 1 : vector<8x256xf32>, i32 -> vector<8x256xf32>
    %c1_70 = arith.constant 1 : index
    %c0_71 = arith.constant 0 : index
    %c0_72 = arith.constant 0 : index
    %124 = vector.load %arg6[%c1_70, %c0_71, %c0_72] : memref<9x1x256xf32, #tpu.memory_space<vmem>>, vector<1x1x256xf32>
    %125 = vector.shape_cast %124 : vector<1x1x256xf32> to vector<1x256xf32>
    %126 = vector.broadcast %125 : vector<1x256xf32> to vector<8x256xf32>
    %127 = arith.mulf %123, %126 : vector<8x256xf32>
    %cst_73 = arith.constant dense<0.000000e+00> : vector<9x256xf32>
    %128 = tpu.matmul %122, %127, %cst_73 {dimension_numbers = #tpu.dot_dimension_numbers<[1], [0], [0], [1], [0, 0, 1, 1], [], []>} : vector<9x8xf32>, vector<8x256xf32>, vector<9x256xf32> -> vector<9x256xf32>
    %129 = arith.addf %120, %128 : vector<9x256xf32>
    %c2_74 = arith.constant 2 : index
    %c0_75 = arith.constant 0 : index
    %c0_76 = arith.constant 0 : index
    %130 = vector.load %arg4[%c2_74, %c0_75, %c0_76] : memref<9x9x8xf32, #tpu.memory_space<vmem>>, vector<1x9x8xf32>
    %131 = vector.shape_cast %130 : vector<1x9x8xf32> to vector<9x8xf32>
    %c15_i32_77 = arith.constant 15 : i32
    %132 = tpu.dynamic_rotate %111 by %c15_i32_77 dim 1 : vector<8x256xf32>, i32 -> vector<8x256xf32>
    %c2_78 = arith.constant 2 : index
    %c0_79 = arith.constant 0 : index
    %c0_80 = arith.constant 0 : index
    %133 = vector.load %arg6[%c2_78, %c0_79, %c0_80] : memref<9x1x256xf32, #tpu.memory_space<vmem>>, vector<1x1x256xf32>
    %134 = vector.shape_cast %133 : vector<1x1x256xf32> to vector<1x256xf32>
    %135 = vector.broadcast %134 : vector<1x256xf32> to vector<8x256xf32>
    %136 = arith.mulf %132, %135 : vector<8x256xf32>
    %cst_81 = arith.constant dense<0.000000e+00> : vector<9x256xf32>
    %137 = tpu.matmul %131, %136, %cst_81 {dimension_numbers = #tpu.dot_dimension_numbers<[1], [0], [0], [1], [0, 0, 1, 1], [], []>} : vector<9x8xf32>, vector<8x256xf32>, vector<9x256xf32> -> vector<9x256xf32>
    %138 = arith.addf %129, %137 : vector<9x256xf32>
    %c3_82 = arith.constant 3 : index
    %c0_83 = arith.constant 0 : index
    %c0_84 = arith.constant 0 : index
    %139 = vector.load %arg4[%c3_82, %c0_83, %c0_84] : memref<9x9x8xf32, #tpu.memory_space<vmem>>, vector<1x9x8xf32>
    %140 = vector.shape_cast %139 : vector<1x9x8xf32> to vector<9x8xf32>
    %c1_i32_85 = arith.constant 1 : i32
    %141 = tpu.dynamic_rotate %111 by %c1_i32_85 dim 1 : vector<8x256xf32>, i32 -> vector<8x256xf32>
    %c3_86 = arith.constant 3 : index
    %c0_87 = arith.constant 0 : index
    %c0_88 = arith.constant 0 : index
    %142 = vector.load %arg6[%c3_86, %c0_87, %c0_88] : memref<9x1x256xf32, #tpu.memory_space<vmem>>, vector<1x1x256xf32>
    %143 = vector.shape_cast %142 : vector<1x1x256xf32> to vector<1x256xf32>
    %144 = vector.broadcast %143 : vector<1x256xf32> to vector<8x256xf32>
    %145 = arith.mulf %141, %144 : vector<8x256xf32>
    %cst_89 = arith.constant dense<0.000000e+00> : vector<9x256xf32>
    %146 = tpu.matmul %140, %145, %cst_89 {dimension_numbers = #tpu.dot_dimension_numbers<[1], [0], [0], [1], [0, 0, 1, 1], [], []>} : vector<9x8xf32>, vector<8x256xf32>, vector<9x256xf32> -> vector<9x256xf32>
    %147 = arith.addf %138, %146 : vector<9x256xf32>
    %c4_90 = arith.constant 4 : index
    %c0_91 = arith.constant 0 : index
    %c0_92 = arith.constant 0 : index
    %148 = vector.load %arg4[%c4_90, %c0_91, %c0_92] : memref<9x9x8xf32, #tpu.memory_space<vmem>>, vector<1x9x8xf32>
    %149 = vector.shape_cast %148 : vector<1x9x8xf32> to vector<9x8xf32>
    %cst_93 = arith.constant dense<0.000000e+00> : vector<9x256xf32>
    %150 = tpu.matmul %149, %111, %cst_93 {dimension_numbers = #tpu.dot_dimension_numbers<[1], [0], [0], [1], [0, 0, 1, 1], [], []>} : vector<9x8xf32>, vector<8x256xf32>, vector<9x256xf32> -> vector<9x256xf32>
    %151 = arith.addf %147, %150 : vector<9x256xf32>
    %c5_94 = arith.constant 5 : index
    %c0_95 = arith.constant 0 : index
    %c0_96 = arith.constant 0 : index
    %152 = vector.load %arg4[%c5_94, %c0_95, %c0_96] : memref<9x9x8xf32, #tpu.memory_space<vmem>>, vector<1x9x8xf32>
    %153 = vector.shape_cast %152 : vector<1x9x8xf32> to vector<9x8xf32>
    %c255_i32_97 = arith.constant 255 : i32
    %154 = tpu.dynamic_rotate %111 by %c255_i32_97 dim 1 : vector<8x256xf32>, i32 -> vector<8x256xf32>
    %c5_98 = arith.constant 5 : index
    %c0_99 = arith.constant 0 : index
    %c0_100 = arith.constant 0 : index
    %155 = vector.load %arg6[%c5_98, %c0_99, %c0_100] : memref<9x1x256xf32, #tpu.memory_space<vmem>>, vector<1x1x256xf32>
    %156 = vector.shape_cast %155 : vector<1x1x256xf32> to vector<1x256xf32>
    %157 = vector.broadcast %156 : vector<1x256xf32> to vector<8x256xf32>
    %158 = arith.mulf %154, %157 : vector<8x256xf32>
    %cst_101 = arith.constant dense<0.000000e+00> : vector<9x256xf32>
    %159 = tpu.matmul %153, %158, %cst_101 {dimension_numbers = #tpu.dot_dimension_numbers<[1], [0], [0], [1], [0, 0, 1, 1], [], []>} : vector<9x8xf32>, vector<8x256xf32>, vector<9x256xf32> -> vector<9x256xf32>
    %160 = arith.addf %151, %159 : vector<9x256xf32>
    %c6_102 = arith.constant 6 : index
    %c0_103 = arith.constant 0 : index
    %c0_104 = arith.constant 0 : index
    %161 = vector.load %arg4[%c6_102, %c0_103, %c0_104] : memref<9x9x8xf32, #tpu.memory_space<vmem>>, vector<1x9x8xf32>
    %162 = vector.shape_cast %161 : vector<1x9x8xf32> to vector<9x8xf32>
    %c241_i32_105 = arith.constant 241 : i32
    %163 = tpu.dynamic_rotate %111 by %c241_i32_105 dim 1 : vector<8x256xf32>, i32 -> vector<8x256xf32>
    %c6_106 = arith.constant 6 : index
    %c0_107 = arith.constant 0 : index
    %c0_108 = arith.constant 0 : index
    %164 = vector.load %arg6[%c6_106, %c0_107, %c0_108] : memref<9x1x256xf32, #tpu.memory_space<vmem>>, vector<1x1x256xf32>
    %165 = vector.shape_cast %164 : vector<1x1x256xf32> to vector<1x256xf32>
    %166 = vector.broadcast %165 : vector<1x256xf32> to vector<8x256xf32>
    %167 = arith.mulf %163, %166 : vector<8x256xf32>
    %cst_109 = arith.constant dense<0.000000e+00> : vector<9x256xf32>
    %168 = tpu.matmul %162, %167, %cst_109 {dimension_numbers = #tpu.dot_dimension_numbers<[1], [0], [0], [1], [0, 0, 1, 1], [], []>} : vector<9x8xf32>, vector<8x256xf32>, vector<9x256xf32> -> vector<9x256xf32>
    %169 = arith.addf %160, %168 : vector<9x256xf32>
    %c7_110 = arith.constant 7 : index
    %c0_111 = arith.constant 0 : index
    %c0_112 = arith.constant 0 : index
    %170 = vector.load %arg4[%c7_110, %c0_111, %c0_112] : memref<9x9x8xf32, #tpu.memory_space<vmem>>, vector<1x9x8xf32>
    %171 = vector.shape_cast %170 : vector<1x9x8xf32> to vector<9x8xf32>
    %c240_i32_113 = arith.constant 240 : i32
    %172 = tpu.dynamic_rotate %111 by %c240_i32_113 dim 1 : vector<8x256xf32>, i32 -> vector<8x256xf32>
    %c7_114 = arith.constant 7 : index
    %c0_115 = arith.constant 0 : index
    %c0_116 = arith.constant 0 : index
    %173 = vector.load %arg6[%c7_114, %c0_115, %c0_116] : memref<9x1x256xf32, #tpu.memory_space<vmem>>, vector<1x1x256xf32>
    %174 = vector.shape_cast %173 : vector<1x1x256xf32> to vector<1x256xf32>
    %175 = vector.broadcast %174 : vector<1x256xf32> to vector<8x256xf32>
    %176 = arith.mulf %172, %175 : vector<8x256xf32>
    %cst_117 = arith.constant dense<0.000000e+00> : vector<9x256xf32>
    %177 = tpu.matmul %171, %176, %cst_117 {dimension_numbers = #tpu.dot_dimension_numbers<[1], [0], [0], [1], [0, 0, 1, 1], [], []>} : vector<9x8xf32>, vector<8x256xf32>, vector<9x256xf32> -> vector<9x256xf32>
    %178 = arith.addf %169, %177 : vector<9x256xf32>
    %c8_118 = arith.constant 8 : index
    %c0_119 = arith.constant 0 : index
    %c0_120 = arith.constant 0 : index
    %179 = vector.load %arg4[%c8_118, %c0_119, %c0_120] : memref<9x9x8xf32, #tpu.memory_space<vmem>>, vector<1x9x8xf32>
    %180 = vector.shape_cast %179 : vector<1x9x8xf32> to vector<9x8xf32>
    %c239_i32_121 = arith.constant 239 : i32
    %181 = tpu.dynamic_rotate %111 by %c239_i32_121 dim 1 : vector<8x256xf32>, i32 -> vector<8x256xf32>
    %c8_122 = arith.constant 8 : index
    %c0_123 = arith.constant 0 : index
    %c0_124 = arith.constant 0 : index
    %182 = vector.load %arg6[%c8_122, %c0_123, %c0_124] : memref<9x1x256xf32, #tpu.memory_space<vmem>>, vector<1x1x256xf32>
    %183 = vector.shape_cast %182 : vector<1x1x256xf32> to vector<1x256xf32>
    %184 = vector.broadcast %183 : vector<1x256xf32> to vector<8x256xf32>
    %185 = arith.mulf %181, %184 : vector<8x256xf32>
    %cst_125 = arith.constant dense<0.000000e+00> : vector<9x256xf32>
    %186 = tpu.matmul %180, %185, %cst_125 {dimension_numbers = #tpu.dot_dimension_numbers<[1], [0], [0], [1], [0, 0, 1, 1], [], []>} : vector<9x8xf32>, vector<8x256xf32>, vector<9x256xf32> -> vector<9x256xf32>
    %187 = arith.addf %178, %186 : vector<9x256xf32>
    %c0_126 = arith.constant 0 : index
    %c0_127 = arith.constant 0 : index
    %188 = vector.load %arg5[%c0_126, %c0_127] : memref<9x1xf32, #tpu.memory_space<vmem>>, vector<9x1xf32>
    %189 = vector.broadcast %188 : vector<9x1xf32> to vector<9x256xf32>
    %190 = arith.addf %187, %189 : vector<9x256xf32>
    %cst_128 = arith.constant 0.000000e+00 : f32
    %191 = vector.broadcast %cst_128 : f32 to vector<9x256xf32>
    %192 = arith.maximumf %190, %191 : vector<9x256xf32>
    %c0_129 = arith.constant 0 : index
    %c0_130 = arith.constant 0 : index
    %c0_131 = arith.constant 0 : index
    %193 = vector.load %arg7[%c0_129, %c0_130, %c0_131] : memref<1x9x256xf32, #tpu.memory_space<vmem>>, vector<1x9x256xf32>
    %194 = vector.shape_cast %193 : vector<1x9x256xf32> to vector<9x256xf32>
    %195 = vector.shape_cast %192 : vector<9x256xf32> to vector<1x9x256xf32>
    tpu.vector_store %arg7[%c0_129, %c0_130, %c0_131], %195 {strides = array<i32>} : memref<1x9x256xf32, #tpu.memory_space<vmem>>, vector<1x9x256xf32>,
    return
  }
  func.func @transform_0(%arg0: i32) -> (i32, i32, i32) {
    %c0_i32 = arith.constant 0 : i32
    %c0_i32_0 = arith.constant 0 : i32
    %c0_i32_1 = arith.constant 0 : i32
    return %arg0, %c0_i32, %c0_i32_0 : i32, i32, i32
  }
  func.func @transform_1(%arg0: i32) -> (i32, i32, i32) {
    %c0_i32 = arith.constant 0 : i32
    %c0_i32_0 = arith.constant 0 : i32
    %c0_i32_1 = arith.constant 0 : i32
    %c0_i32_2 = arith.constant 0 : i32
    return %c0_i32, %c0_i32_0, %c0_i32_1 : i32, i32, i32
  }
  func.func @transform_2(%arg0: i32) -> (i32, i32) {
    %c0_i32 = arith.constant 0 : i32
    %c0_i32_0 = arith.constant 0 : i32
    %c0_i32_1 = arith.constant 0 : i32
    return %c0_i32, %c0_i32_0 : i32, i32
  }
  func.func @transform_3(%arg0: i32) -> (i32, i32, i32) {
    %c0_i32 = arith.constant 0 : i32
    %c0_i32_0 = arith.constant 0 : i32
    %c0_i32_1 = arith.constant 0 : i32
    %c0_i32_2 = arith.constant 0 : i32
    return %c0_i32, %c0_i32_0, %c0_i32_1 : i32, i32, i32
  }
  func.func @transform_4(%arg0: i32) -> (i32, i32) {
    %c0_i32 = arith.constant 0 : i32
    %c0_i32_0 = arith.constant 0 : i32
    %c0_i32_1 = arith.constant 0 : i32
    return %c0_i32, %c0_i32_0 : i32, i32
  }
  func.func @transform_5(%arg0: i32) -> (i32, i32, i32) {
    %c0_i32 = arith.constant 0 : i32
    %c0_i32_0 = arith.constant 0 : i32
    %c0_i32_1 = arith.constant 0 : i32
    %c0_i32_2 = arith.constant 0 : i32
    return %c0_i32, %c0_i32_0, %c0_i32_1 : i32, i32, i32
  }
  func.func @transform_6(%arg0: i32) -> (i32, i32, i32) {
    %c0_i32 = arith.constant 0 : i32
    %c0_i32_0 = arith.constant 0 : i32
    %c0_i32_1 = arith.constant 0 : i32
    return %arg0, %c0_i32, %c0_i32_0 : i32, i32, i32
  }
}

</mosaic_0001>

<bundles_post_ra>
// kernel: model_forward.1
= control target key start
LH: loop header
LB: loop body
LE: loop exit
PB: predicated region body
PF: predicated region fallthrough
CT: control target
= control target key end

     0   :  { %s2771_s21 = smov 0   ;;  %s3451_s0 = inlined_call_operand.vmem [shape: f32[2,9,256], index: 0, kind: input, shape index: {}]   ;;  %s3452_s1 = inlined_call_operand.vmem [shape: f32[9,17,9], index: 1, kind: input, shape index: {}]   ;;  %s3453_s2 = inlined_call_operand.vmem [shape: f32[8,1], index: 2, kind: input, shape index: {}]   ;;  %s3454_s3 = inlined_call_operand.vmem [shape: f32[9,9,8], index: 3, kind: input, shape index: {}]   ;;  %s3455_s4 = inlined_call_operand.vmem [shape: f32[9,1], index: 4, kind: input, shape index: {}]   ;;  %s3456_s5 = inlined_call_operand.vmem [shape: f32[9,1,256], index: 5, kind: input, shape index: {}]   ;;  %s3457_s6 = inlined_call_operand.vmem [shape: f32[2,9,256], index: 6, kind: output, shape index: {}]  }
   0x1 LB: > { %s2433_s22 = sadd.s32 4294967295, %s2723_s21   ;;  %p2437_p0 = scmp.ge.s32.totalorder %s2723_s21, 1  ;;  %s2723_s21 = sphi %s2771_s21, %s16_s21  }
   0x2   : > { %p212_p1 = scmp.lt.s32.totalorder %s2723_s21, 3 }
   0x4   : > { %p213_p2 = pnand %p2437_p0, %p212_p1 }
   0x5   : > { %p242_p3 = scmp.lt.s32.totalorder (!%p213_p2), %s2433_s22, 1  ;;  %v2725_v2 = vmov (!%p213_p2), 0.0   ;;  %s2726_s27 = smov (!%p213_p2), 17   ;;  %v1470_v7 = vld [vmem:[%s3453_s2] sm:$0xff] (!%p213_p2)  ;;  %v2734_v8 = vmov (!%p213_p2), 0   ;;  %v267_v9 = vlaneseq (!%p213_p2)  ;;  %vm300_vm1 = vcmask (!%p213_p2), 1040384  }
   0x6   : > { %216 = sbr.rel (%p213_p2) target bundleno = 847 (0x34f), region = 44  ;;  %371 = vmatprep.mubr.f32.mxu1 (!%p213_p2), %v2725_v2  ;;  %1307 = vmatprep.mubr.f32.mxu0 (!%p213_p2), %v2725_v2  ;;  %s2727_s28 = smov (!%p213_p2), 16   ;;  %v274_v14 = vld [vmem:[%s3456_s5] sm:$0x3] (!%p213_p2)  ;;  %vm2735_vm2 = vmmov (!%p213_p2), 1   ;;  %vm290_vm5 = vcmask (!%p213_p2), 72704  }
   0x7   : > { %s2728_s29 = smov (!%p213_p2), 15   ;;  %s2729_s30 = smov (!%p213_p2), 1   ;;  %2715 = vset.pattern.permute.xlu0 (!%p213_p2), %v2734_v8  ;;  %2716 = vset.pattern.permute.xlu1 (!%p213_p2), %v2734_v8  ;;  %v277_v10 = vshrl.u32 (!%p213_p2), %v267_v9, 7  ;;  %v2868_v11 = vand.u32 (!%p213_p2), 127, %v267_v9  ;;  %vm2896_vm3 = vmpackc.low (!%p213_p2), %vm300_vm1, %vm2735_vm2  ;;  %v2450_v30 = vld [vmem:[%s3456_s5 + $0x2] sm:$0x3] (!%p213_p2) }
   0x8   : > { %s2730_s7 = smov (!%p213_p2), 127   ;;  %s2731_s8 = smov (!%p213_p2), 112   ;;  %v256_v37 = vld [vmem:[%s3452_s1] sm:$0xff] (!%p213_p2)  ;;  %v257_v48 = vld [vmem:[%s3452_s1 + $0x8] sm:$0xff] (!%p213_p2)  ;;  %v258_v56 = vld [vmem:[%s3452_s1 + $0x10] sm:$0x1] (!%p213_p2) }
   0x9   : > { %s2732_s9 = smov (!%p213_p2), 113   ;;  %s2733_s10 = smov (!%p213_p2), 111   ;;  %v2870_v12 = vsub.s32 (!%p213_p2), 0, %v277_v10  ;;  %v2872_v13 = vsub.s32 (!%p213_p2), 1, %v277_v10  ;;  %vm269_vm0 = vcmp.lt.s32.totalorder (!%p213_p2), %v2868_v11, 17  ;;  %vm408_vm4 = vcmp.lt.s32.totalorder (!%p213_p2), %v2868_v11, 16 }
   0xa   : > { %v2459_v49 = vld [vmem:[%s3456_s5 + $0x4] sm:$0x3] (!%p213_p2)  ;;  %vm546_vm6 = vcmp.lt.s32.totalorder (!%p213_p2), %v2868_v11, 15  ;;  %v2447_v10 = vld [vmem:[%s3452_s1 + $0x18] sm:$0xff] (!%p213_p2)  ;;  %vm684_vm7 = vcmp.lt.s32.totalorder (!%p213_p2), %v2868_v11, 1  ;;  %vm930_vm8 = vcmp.lt.s32.totalorder (!%p213_p2), %v2868_v11, 127 }
   0xb   : > { %v2879_v17 = vrot.slane (!%p213_p2), %v274_v14, %v2870_v12  ;;  %v2882_v18 = vrot.slane (!%p213_p2), %v274_v14, %v2872_v13  ;;  %v2907_v35 = vrot.slane (!%p213_p2), %v2450_v30, %v2870_v12  ;;  %v2910_v36 = vrot.slane (!%p213_p2), %v2450_v30, %v2872_v13  ;;  %v2468_v14 = vld [vmem:[%s3456_s5 + $0x6] sm:$0x3] (!%p213_p2)  ;;  %v2501_v29 = vld [vmem:[%s3452_s1 + $0xb0] sm:$0xff] (!%p213_p2) }
   0xc   : > { %v2942_v54 = vrot.slane (!%p213_p2), %v2459_v49, %v2870_v12  ;;  %v2945_v55 = vrot.slane (!%p213_p2), %v2459_v49, %v2872_v13  ;;  %vm1206_vm9 = vcmp.lt.s32.totalorder (!%p213_p2), %v2868_v11, 112  ;;  %vm1068_vm10 = vcmp.lt.s32.totalorder (!%p213_p2), %v2868_v11, 113 }
   0xd   : > { %s3461_s22 = smov (!%p242_p3, %s2433_s22), 1  ;;  %vm1344_vm11 = vcmp.lt.s32.totalorder %v2868_v11, 111  ;;  %vm1490_vm12 = vcmask 64512   ;;  %v2545_v11 = vld [vmem:[%s3454_s3 + $0x78] sm:$0x1] }
   0xe   : > { %s2554_s23 = sshll.u32 %s3461_s22, 5 }
   0xf   : > { %s246_s26 = scalar_lea.vmem %s3451_s0, %s2554_s23 }
  0x10   : > { %v2787_v0 = vld [vmem:[%s246_s26 + $0x8] sm:$0xff]  ;;  %v2789_v1 = vld [vmem:[%s246_s26] sm:$0xff]  ;;  %v2796_v3 = vld [vmem:[%s246_s26 + $0x18] sm:$0x1] }
  0x11   : > { %263 = vrot.lane.b32.xlu1 %v2787_v0, %s2726_s27  ;;  %259 = vrot.lane.b32.xlu0 %v2789_v1, %s2726_s27  ;;  %v2798_v4 = vld [vmem:[%s246_s26 + $0x10] sm:$0x1]  ;;  %v2580_v5 = vpack.c.bf16 %v2796_v3, %v2787_v0 }
  0x12   : > { %v2583_v6 = vpack.c.bf16 %v2798_v4, %v2789_v1 }
  0x15   : > { %265 = vrot.lane.b32.xlu1 %v2796_v3, %s2726_s27  ;;  %261 = vrot.lane.b32.xlu0 %v2798_v4, %s2726_s27 }
  0x19   : > { %402 = vrot.lane.b32.xlu1 %v2798_v4, %s2727_s28  ;;  %400 = vrot.lane.b32.xlu0 %v2789_v1, %s2727_s28 }
  0x1d   : > { %406 = vrot.lane.b32.xlu1 %v2796_v3, %s2727_s28  ;;  %404 = vrot.lane.b32.xlu0 %v2787_v0, %s2727_s28 }
  0x21   : > { %540 = vrot.lane.b32.xlu1 %v2798_v4, %s2728_s29  ;;  %538 = vrot.lane.b32.xlu0 %v2789_v1, %s2728_s29 }
  0x25   : > { %544 = vrot.lane.b32.xlu1 %v2796_v3, %s2728_s29  ;;  %542 = vrot.lane.b32.xlu0 %v2787_v0, %s2728_s29 }
  0x29   : > { %678 = vrot.lane.b32.xlu1 %v2798_v4, %s2729_s30  ;;  %676 = vrot.lane.b32.xlu0 %v2789_v1, %s2729_s30 }
  0x2d   : > { %682 = vrot.lane.b32.xlu1 %v2796_v3, %s2729_s30  ;;  %680 = vrot.lane.b32.xlu0 %v2787_v0, %s2729_s30 }
  0x31   : > { %924 = vrot.lane.b32.xlu1 %v2798_v4, %s2730_s7  ;;  %922 = vrot.lane.b32.xlu0 %v2789_v1, %s2730_s7 }
  0x35   : > { %928 = vrot.lane.b32.xlu1 %v2796_v3, %s2730_s7  ;;  %926 = vrot.lane.b32.xlu0 %v2787_v0, %s2730_s7 }
  0x39   : > { %1200 = vrot.lane.b32.xlu1 %v2798_v4, %s2731_s8  ;;  %1198 = vrot.lane.b32.xlu0 %v2789_v1, %s2731_s8 }
  0x3d   : > { %1204 = vrot.lane.b32.xlu1 %v2796_v3, %s2731_s8  ;;  %1202 = vrot.lane.b32.xlu0 %v2787_v0, %s2731_s8 }
  0x41   : > { %1062 = vrot.lane.b32.xlu1 %v2798_v4, %s2732_s9  ;;  %1060 = vrot.lane.b32.xlu0 %v2789_v1, %s2732_s9 }
  0x45   : > { %1066 = vrot.lane.b32.xlu1 %v2796_v3, %s2732_s9  ;;  %1064 = vrot.lane.b32.xlu0 %v2787_v0, %s2732_s9 }
  0x49   : > { %1338 = vrot.lane.b32.xlu1 %v2798_v4, %s2733_s10  ;;  %1336 = vrot.lane.b32.xlu0 %v2789_v1, %s2733_s10  ;;  %v2500_v1 = vld [vmem:[%s3452_s1 + $0xa8] sm:$0xff] }
  0x4d   : > { %1342 = vrot.lane.b32.xlu1 %v2796_v3, %s2733_s10  ;;  %1340 = vrot.lane.b32.xlu0 %v2787_v0, %s2733_s10  ;;  %v2458_v3 = vld [vmem:[%s3452_s1 + $0x40] sm:$0x1] }
  0x51   : > { %1473 = vperm.xlu0 %2715, %v1470_v7  }
  0x83   : > { %v264_v15 = vpop.permute.xlu1 %263  ;;  %v260_v16 = vpop.permute.xlu0 %259 }
  0x84   : > { %v270_v19 = vsel %vm269_vm0, %v260_v16, %v264_v15  ;;  %v272_v20 = vsel %vm269_vm0, %v264_v15, %v260_v16 }
  0x85   : > { %v286_v25 = vmul.f32 %v2879_v17, %v272_v20  ;;  %v287_v26 = vmul.f32 %v2882_v18, %v270_v19 }
  0x87   : > { %v266_v21 = vpop.permute.xlu1 %265  ;;  %v262_v22 = vpop.permute.xlu0 %261 }
  0x88   : > { %v271_v23 = vsel %vm269_vm0, %v262_v22, %v266_v21  ;;  %v273_v24 = vsel %vm269_vm0, %v266_v21, %v262_v22  ;;  %v2978_v21 = vrot.slane %v2468_v14, %v2872_v13  ;;  %v2448_v22 = vld [vmem:[%s3452_s1 + $0x20] sm:$0xff] }
  0x89   : > { %v288_v27 = vmul.f32 %v2879_v17, %v273_v24  ;;  %v289_v28 = vmul.f32 %v2882_v18, %v271_v23  ;;  %v2987_v23 = vrot.slane %v2468_v14, %v2870_v12 }
  0x8b   : > { %v403_v31 = vpop.permute.xlu1 %402  ;;  %v401_v32 = vpop.permute.xlu0 %400  ;;  %v2556_v33 = vpack.c.bf16 %v289_v28, %v287_v26  ;;  %v2559_v34 = vpack.c.bf16 %v288_v27, %v286_v25 }
  0x8d   : > { %2558 = vmatprep.subr.msk.bf16.mxu1 %vm2896_vm3, %v2556_v33  ;;  %v2449_v33 = vld [vmem:[%s3452_s1 + $0x28] sm:$0x1] }
  0x8e   : > { %2561 = vmatpush1.bf16.msk.msra.mxu1 %vm2896_vm3, %v2559_v34 }
  0x8f   : > { %v407_v38 = vpop.permute.xlu1 %406  ;;  %v405_v39 = vpop.permute.xlu0 %404 }
  0x90   : > { %v410_v40 = vsel %vm408_vm4, %v403_v31, %v407_v38  ;;  %v412_v41 = vsel %vm408_vm4, %v407_v38, %v403_v31  ;;  %v409_v42 = vsel %vm408_vm4, %v401_v32, %v405_v39  ;;  %v411_v43 = vsel %vm408_vm4, %v405_v39, %v401_v32 }
  0x91   : > { %v428_v44 = vmul.f32 %v2907_v35, %v412_v41  ;;  %v429_v45 = vmul.f32 %v2910_v36, %v410_v40  ;;  %v426_v46 = vmul.f32 %v2907_v35, %v411_v43  ;;  %v427_v47 = vmul.f32 %v2910_v36, %v409_v42  ;;  %2444 = vmatmul.mubr.msk.f32.vlgmr.msra.gmra.mrb[0].mxu1 %vm290_vm5, %v256_v37  ;;  %v2456_v42 = vld [vmem:[%s3452_s1 + $0x30] sm:$0xff] }
  0x92   : > { %377 = vmatprep.mubr.f32.mxu1 %v2725_v2 }
  0x93   : > { %v2562_v50 = vpack.c.bf16 %v429_v45, %v427_v47  ;;  %v2565_v51 = vpack.c.bf16 %v428_v44, %v426_v46  ;;  %v541_v52 = vpop.permute.xlu1 %540  ;;  %v539_v53 = vpop.permute.xlu0 %538  ;;  %v2485_v45 = vld [vmem:[%s3456_s5 + $0xa] sm:$0x3]  ;;  %v2457_v46 = vld [vmem:[%s3452_s1 + $0x38] sm:$0xff]  ;;  %v2503_v47 = vld [vmem:[%s3456_s5 + $0xe] sm:$0x3] }
  0x94   : > { %v3051_v0 = vrot.slane %v2503_v47, %v2872_v13 }
  0x95   : > { %2445 = vmatmul.mubr.msk.f32.gmra.mrb[2].mxu1 %vm290_vm5, %v257_v48  ;;  %2564 = vmatprep.subr.msk.bf16.mxu1 %vm2896_vm3, %v2562_v50  ;;  %v3032_v48 = vrot.slane %v2485_v45, %v2872_v13 }
  0x96   : > { %2567 = vmatpush1.bf16.msk.msra.mxu1 %vm2896_vm3, %v2565_v51  ;;  %383 = vmatprep.mubr.f32.mxu1 %v2725_v2 }
  0x97   : > { %v545_v57 = vpop.permute.xlu1 %544  ;;  %v543_v58 = vpop.permute.xlu0 %542 }
  0x98   : > { %v548_v59 = vsel %vm546_vm6, %v541_v52, %v545_v57  ;;  %v550_v60 = vsel %vm546_vm6, %v545_v57, %v541_v52  ;;  %v547_v61 = vsel %vm546_vm6, %v539_v53, %v543_v58  ;;  %v549_v62 = vsel %vm546_vm6, %v543_v58, %v539_v53 }
  0x99   : > { %2446 = vmatmul.mubr.msk.f32.gmra.mrb[4].mxu1 %vm290_vm5, %v258_v56  ;;  %v566_v63 = vmul.f32 %v2942_v54, %v550_v60  ;;  %v567_v7 = vmul.f32 %v2945_v55, %v548_v59  ;;  %v564_v8 = vmul.f32 %v2942_v54, %v549_v62  ;;  %v565_v9 = vmul.f32 %v2945_v55, %v547_v61 }
  0x9a   : > { %509 = vmatprep.mubr.f32.mxu1 %v2725_v2  ;;  %v3048_v53 = vrot.slane %v2503_v47, %v2870_v12 }
  0x9b   : > { %v2568_v15 = vpack.c.bf16 %v567_v7, %v565_v9  ;;  %v2571_v16 = vpack.c.bf16 %v566_v63, %v564_v8  ;;  %v679_v19 = vpop.permute.xlu1 %678  ;;  %v677_v20 = vpop.permute.xlu0 %676 }
  0x9d   : > { %2453 = vmatmul.mubr.msk.f32.vlgmr.msra.gmra.mrb[0].mxu1 %vm290_vm5, %v2447_v10  ;;  %2570 = vmatprep.subr.msk.bf16.mxu1 %vm2896_vm3, %v2568_v15  ;;  %v2465_v10 = vld [vmem:[%s3452_s1 + $0x48] sm:$0xff] }
  0x9e   : > { %515 = vmatprep.mubr.f32.mxu1 %v2725_v2  ;;  %2573 = vmatpush1.bf16.msk.msra.mxu1 %vm2896_vm3, %v2571_v16 }
  0x9f   : > { %v683_v24 = vpop.permute.xlu1 %682  ;;  %v681_v25 = vpop.permute.xlu0 %680 }
  0xa0   : > { %v686_v26 = vsel %vm684_vm7, %v679_v19, %v683_v24  ;;  %v688_v27 = vsel %vm684_vm7, %v683_v24, %v679_v19  ;;  %v685_v28 = vsel %vm684_vm7, %v677_v20, %v681_v25  ;;  %v687_v30 = vsel %vm684_vm7, %v681_v25, %v677_v20  ;;  %v2466_v24 = vld [vmem:[%s3452_s1 + $0x50] sm:$0xff] }
  0xa1   : > { %2454 = vmatmul.mubr.msk.f32.gmra.mrb[2].mxu1 %vm290_vm5, %v2448_v22  ;;  %v705_v31 = vmul.f32 %v2978_v21, %v686_v26  ;;  %v703_v32 = vmul.f32 %v2978_v21, %v685_v28  ;;  %v704_v34 = vmul.f32 %v2987_v23, %v688_v27  ;;  %v702_v37 = vmul.f32 %v2987_v23, %v687_v30  ;;  %v2494_v22 = vld [vmem:[%s3456_s5 + $0xc] sm:$0x3] }
  0xa2   : > { %521 = vmatprep.mubr.f32.mxu1 %v2725_v2  ;;  %v3098_v25 = vrot.slane %v2485_v45, %v2870_v12  ;;  %v3103_v26 = vrot.slane %v2494_v22, %v2872_v13 }
  0xa3   : > { %v2574_v38 = vpack.c.bf16 %v705_v31, %v703_v32  ;;  %v3006_v39 = vpop.permute.xlu1 %924  ;;  %v3008_v40 = vpop.permute.xlu0 %922  ;;  %v2577_v41 = vpack.c.bf16 %v704_v34, %v702_v37  ;;  %v2467_v32 = vld [vmem:[%s3452_s1 + $0x58] sm:$0x1] }
  0xa5   : > { %2455 = vmatmul.mubr.msk.f32.gmra.mrb[4].mxu1 %vm290_vm5, %v2449_v33  ;;  %2576 = vmatprep.subr.msk.bf16.mxu1 %vm2896_vm3, %v2574_v38  ;;  %v2512_v33 = vld [vmem:[%s3456_s5 + $0x10] sm:$0x3] }
  0xa6   : > { %647 = vmatprep.mubr.f32.mxu1 %v2725_v2 }
  0xa7   : > { %v929_v43 = vpop.permute.xlu1 %928  ;;  %v927_v44 = vpop.permute.xlu0 %926 }
  0xa8   : > { %v934_v51 = vsel %vm930_vm8, %v929_v43, %v3006_v39  ;;  %v933_v52 = vsel %vm930_vm8, %v927_v44, %v3008_v40  ;;  %v932_v4 = vsel %vm930_vm8, %v3006_v39, %v929_v43  ;;  %v3141_v43 = vrot.slane %v2512_v33, %v2872_v13 }
  0xa9   : > { %2462 = vmatmul.mubr.msk.f32.vlgmr.msra.gmra.mrb[0].mxu1 %vm290_vm5, %v2456_v42  ;;  %v949_v56 = vmul.f32 %v3032_v48, %v933_v52  ;;  %v950_v34 = vmul.f32 %v3098_v25, %v932_v4  ;;  %v3138_v42 = vrot.slane %v2512_v33, %v2870_v12  ;;  %v2511_v4 = vld [vmem:[%s3452_s1 + $0xd0] sm:$0x1] }
  0xaa   : > { %653 = vmatprep.mubr.f32.mxu1 %v2725_v2  ;;  %2579 = vmatpush1.bf16.msk.msra.mxu1 %vm2896_vm3, %v2577_v41 }
  0xab   : > { %v1201_v49 = vpop.permute.xlu1 %1200  ;;  %v1199_v50 = vpop.permute.xlu0 %1198  ;;  %2582 = vmatprep.subr.msk.bf16.mxu1 %vm2896_vm3, %v2580_v5  ;;  %v951_v5 = vmul.f32 %v3032_v48, %v934_v51 }
  0xad   : > { %2463 = vmatmul.mubr.msk.f32.gmra.mrb[2].mxu1 %vm290_vm5, %v2457_v46  ;;  %v2586_v14 = vpack.c.bf16 %v951_v5, %v949_v56 }
  0xae   : > { %659 = vmatprep.mubr.f32.mxu1 %v2725_v2 }
  0xaf   : > { %v1205_v57 = vpop.permute.xlu1 %1204  ;;  %v1203_v58 = vpop.permute.xlu0 %1202 }
  0xb0   : > { %v1208_v59 = vsel %vm1206_vm9, %v1201_v49, %v1205_v57  ;;  %v1210_v60 = vsel %vm1206_vm9, %v1205_v57, %v1201_v49  ;;  %v1207_v61 = vsel %vm1206_vm9, %v1199_v50, %v1203_v58  ;;  %v1209_v62 = vsel %vm1206_vm9, %v1203_v58, %v1199_v50  ;;  %v2475_v58 = vld [vmem:[%s3452_s1 + $0x68] sm:$0xff] }
  0xb1   : > { %2464 = vmatmul.mubr.msk.f32.gmra.mrb[4].mxu1 %vm290_vm5, %v2458_v3  ;;  %v1226_v63 = vmul.f32 %v3048_v53, %v1208_v59  ;;  %v1227_v7 = vmul.f32 %v3051_v0, %v1210_v60  ;;  %v1224_v8 = vmul.f32 %v3048_v53, %v1207_v61  ;;  %v1225_v9 = vmul.f32 %v3051_v0, %v1209_v62 }
  0xb2   : > { %785 = vmatprep.mubr.f32.mxu1 %v2725_v2  ;;  %v3169_v61 = vrot.slane %v2494_v22, %v2870_v12  ;;  %v2509_v12 = vld [vmem:[%s3452_s1 + $0xc0] sm:$0xff]  ;;  %v2491_v22 = vld [vmem:[%s3452_s1 + $0x90] sm:$0xff] }
  0xb3   : > { %v1063_v15 = vpop.permute.xlu1 %1062  ;;  %v1061_v16 = vpop.permute.xlu0 %1060  ;;  %v3076_v19 = vpack.c.bf16 %v1227_v7, %v1225_v9  ;;  %v3078_v20 = vpack.c.bf16 %v1226_v63, %v1224_v8  ;;  %v2476_v7 = vld [vmem:[%s3452_s1 + $0x70] sm:$0x1] }
  0xb5   : > { %2471 = vmatmul.mubr.msk.f32.vlgmr.msra.gmra.mrb[0].mxu1 %vm290_vm5, %v2465_v10  ;;  %2600 = vmatprep.subr.msk.bf16.mxu0 %vm2896_vm3, %v3076_v19  ;;  %v2482_v10 = vld [vmem:[%s3452_s1 + $0x78] sm:$0xff] }
  0xb6   : > { %791 = vmatprep.mubr.f32.mxu1 %v2725_v2  ;;  %2585 = vmatpush1.bf16.msk.msra.mxu1 %vm2896_vm3, %v2583_v6  ;;  %v931_v6 = vsel %vm930_vm8, %v3008_v40, %v927_v44  ;;  %v2474_v44 = vld [vmem:[%s3452_s1 + $0x60] sm:$0xff] }
  0xb7   : > { %2588 = vmatprep.subr.msk.bf16.mxu1 %vm2896_vm3, %v2586_v14  ;;  %v1067_v27 = vpop.permute.xlu1 %1066  ;;  %v1065_v28 = vpop.permute.xlu0 %1064  ;;  %2603 = vmatpush1.bf16.msk.msra.mxu0 %vm2896_vm3, %v3078_v20  ;;  %v948_v37 = vmul.f32 %v3098_v25, %v931_v6 }
  0xb8   : > { %v1072_v30 = vsel %vm1068_vm10, %v1067_v27, %v1063_v15  ;;  %v1071_v31 = vsel %vm1068_vm10, %v1065_v28, %v1061_v16  ;;  %v1070_v62 = vsel %vm1068_vm10, %v1063_v15, %v1067_v27  ;;  %v1069_v63 = vsel %vm1068_vm10, %v1061_v16, %v1065_v28  ;;  %v2483_v15 = vld [vmem:[%s3452_s1 + $0x80] sm:$0xff]  ;;  %v2484_v16 = vld [vmem:[%s3452_s1 + $0x88] sm:$0x1] }
  0xb9   : > { %2472 = vmatmul.mubr.msk.f32.gmra.mrb[2].mxu1 %vm290_vm5, %v2466_v24  ;;  %v1089_v38 = vmul.f32 %v3103_v26, %v1072_v30  ;;  %v1087_v39 = vmul.f32 %v3103_v26, %v1071_v31  ;;  %v2589_v45 = vpack.c.bf16 %v950_v34, %v948_v37  ;;  %v1088_v8 = vmul.f32 %v3169_v61, %v1070_v62  ;;  %v2493_v24 = vld [vmem:[%s3452_s1 + $0xa0] sm:$0x1] }
  0xba   : > { %797 = vmatprep.mubr.f32.mxu1 %v2725_v2  ;;  %2506 = vmatmul.mubr.msk.f32.vlgmr.msra.gmra.mrb[0].mxu0 %vm290_vm5, %v2500_v1  ;;  %v1086_v9 = vmul.f32 %v3169_v61, %v1069_v63  ;;  %v2510_v1 = vld [vmem:[%s3452_s1 + $0xc8] sm:$0xff] }
  0xbb   : > { %v1339_v40 = vpop.permute.xlu1 %1338  ;;  %v1337_v41 = vpop.permute.xlu0 %1336  ;;  %1445 = vmatprep.mubr.f32.mxu0 %v2725_v2  ;;  %v2592_v46 = vpack.c.bf16 %v1089_v38, %v1087_v39 }
  0xbc   : > { %v2595_v14 = vpack.c.bf16 %v1088_v8, %v1086_v9 }
  0xbd   : > { %2473 = vmatmul.mubr.msk.f32.gmra.mrb[4].mxu1 %vm290_vm5, %v2467_v32 }
  0xbe   : > { %893 = vmatprep.mubr.f32.mxu1 %v2725_v2 }
  0xbf   : > { %v1343_v47 = vpop.permute.xlu1 %1342  ;;  %v1341_v49 = vpop.permute.xlu0 %1340 }
  0xc0   : > { %v1346_v50 = vsel %vm1344_vm11, %v1339_v40, %v1343_v47  ;;  %v1348_v51 = vsel %vm1344_vm11, %v1343_v47, %v1339_v40  ;;  %v1345_v13 = vsel %vm1344_vm11, %v1337_v41, %v1341_v49  ;;  %v1347_v52 = vsel %vm1344_vm11, %v1341_v49, %v1337_v41  ;;  %v2355_v47 = vld [vmem:[%s3455_s4 + $0x8] sm:$0x1] }
  0xc1   : > { %2479 = vmatmul.mubr.msk.f32.vlgmr.msra.gmra.mrb[0].mxu1 %vm290_vm5, %v2474_v44  ;;  %v1364_v3 = vmul.f32 %v3138_v42, %v1346_v50  ;;  %v1365_v5 = vmul.f32 %v3141_v43, %v1348_v51  ;;  %v1362_v56 = vmul.f32 %v3138_v42, %v1345_v13  ;;  %v1363_v57 = vmul.f32 %v3141_v43, %v1347_v52 }
  0xc2   : > { %2591 = vmatpush1.bf16.msk.msra.mxu1 %vm2896_vm3, %v2589_v45  ;;  %899 = vmatprep.mubr.f32.mxu1 %v2725_v2 }
  0xc3   : > { %v2604_v59 = vpack.c.bf16 %v1365_v5, %v1363_v57  ;;  %v2607_v60 = vpack.c.bf16 %v1364_v3, %v1362_v56  ;;  %2594 = vmatprep.subr.msk.bf16.mxu1 %vm2896_vm3, %v2592_v46  ;;  %v2354_v46 = vld [vmem:[%s3455_s4] sm:$0xff] }
  0xc4   : > { %v1480_v56 = vld [vmem:[%s3454_s3] sm:$0xff] }
  0xc5   : > { %2480 = vmatmul.mubr.msk.f32.gmra.mrb[2].mxu1 %vm290_vm5, %v2475_v58  ;;  %2606 = vmatprep.subr.msk.bf16.mxu0 %vm2896_vm3, %v2604_v59 }
  0xc6   : > { %905 = vmatprep.mubr.f32.mxu1 %v2725_v2  ;;  %2609 = vmatpush1.bf16.msk.msra.mxu0 %vm2896_vm3, %v2607_v60 }
  0xc9   : > { %2481 = vmatmul.mubr.msk.f32.gmra.mrb[4].mxu1 %vm290_vm5, %v2476_v7  ;;  %2515 = vmatmul.mubr.msk.f32.vlgmr.msra.gmra.mrb[0].mxu0 %vm290_vm5, %v2509_v12 }
  0xca   : > { %1031 = vmatprep.mubr.f32.mxu1 %v2725_v2  ;;  %1451 = vmatprep.mubr.f32.mxu0 %v2725_v2 }
  0xcd   : > { %2488 = vmatmul.mubr.msk.f32.vlgmr.msra.gmra.mrb[0].mxu1 %vm290_vm5, %v2482_v10  ;;  %2516 = vmatmul.mubr.msk.f32.gmra.mrb[2].mxu0 %vm290_vm5, %v2510_v1 }
  0xce   : > { %2597 = vmatpush1.bf16.msk.msra.mxu1 %vm2896_vm3, %v2595_v14  ;;  %1037 = vmatprep.mubr.f32.mxu1 %v2725_v2 }
  0xcf   : > { %2610 = vmatprep.subr.msk.bf16.mxu1 %vm2896_vm3, %v3076_v19  ;;  %v2492_v19 = vld [vmem:[%s3452_s1 + $0x98] sm:$0xff]  ;;  %1457 = vmatprep.mubr.f32.mxu0 %v2725_v2 }
  0xd0   : > { %v1474_v30 = vpop.permute.xlu0 %1473 }
  0xd1   : > { %2489 = vmatmul.mubr.msk.f32.gmra.mrb[2].mxu1 %vm290_vm5, %v2483_v15  ;;  %2517 = vmatmul.mubr.msk.f32.gmra.mrb[4].mxu0 %vm290_vm5, %v2511_v4 }
  0xd2   : > { %1043 = vmatprep.mubr.f32.mxu1 %v2725_v2  ;;  %1561 = vmatprep.mubr.f32.mxu0 %v2725_v2 }
  0xd5   : > { %2490 = vmatmul.mubr.msk.f32.gmra.mrb[4].mxu1 %vm290_vm5, %v2484_v16 }
  0xd6   : > { %1169 = vmatprep.mubr.f32.mxu1 %v2725_v2 }
  0xd9   : > { %2497 = vmatmul.mubr.msk.f32.vlgmr.msra.gmra.mrb[0].mxu1 %vm290_vm5, %v2491_v22  ;;  %v2525_v22 = vld [vmem:[%s3454_s3 + $0x28] sm:$0x1] }
  0xda   : > { %2611 = vmatpush1.bf16.msk.msra.mxu1 %vm2896_vm3, %v3078_v20  ;;  %1175 = vmatprep.mubr.f32.mxu1 %v2725_v2  ;;  %v2502_v20 = vld [vmem:[%s3452_s1 + $0xb8] sm:$0x1] }
  0xdd   : > { %2498 = vmatmul.mubr.msk.f32.gmra.mrb[2].mxu1 %vm290_vm5, %v2492_v19 }
  0xde   : > { %1181 = vmatprep.mubr.f32.mxu1 %v2725_v2 }
  0xe1   : > { %2499 = vmatmul.mubr.msk.f32.gmra.mrb[4].mxu1 %vm290_vm5, %v2493_v24 }
  0xe2   : > { %1313 = vmatprep.mubr.f32.mxu1 %v2725_v2 }
  0xe5   : > { %2507 = vmatmul.mubr.msk.f32.vlgmr.msra.gmra.mrb[2].mxu1 %vm290_vm5, %v2501_v29 }
  0xe6   : > { %1319 = vmatprep.mubr.f32.mxu1 %v2725_v2 }
  0xe9   : > { %2508 = vmatmul.mubr.msk.f32.gmra.mrb[4].mxu1 %vm290_vm5, %v2502_v20 }
 0x19c   : > { %v1447_v27 = vpop.f32.mrb[0].mxu0 }
 0x19d   : > { %v1449_v28 = vpop.f32.mrb[1].mxu0 }
 0x1ac   : > { %v1171_v6 = vpop.f32.mrb[0].mxu1 }
 0x1ad   : > { %v2612_v31 = vadd.f32 %v1447_v27, %v1171_v6  ;;  %v1173_v32 = vpop.f32.mrb[1].mxu1  ;;  %v2529_v27 = vld [vmem:[%s3454_s3 + $0x38] sm:$0x1]  ;;  %v2532_v6 = vld [vmem:[%s3454_s3 + $0x40] sm:$0xff] }
 0x1ae   : > { %v2613_v33 = vadd.f32 %v1449_v28, %v1173_v32  ;;  %v2533_v32 = vld [vmem:[%s3454_s3 + $0x48] sm:$0x1] }
 0x1af   : > { %v1476_v34 = vadd.f32 %v2612_v31, %v1474_v30 }
 0x1b0   : > { %v1477_v37 = vadd.f32 %v2613_v33, %v1474_v30 }
 0x1b1   : > { %v3250_v38 = vmax.f32 %v1476_v34, 0.0 }
 0x1b2   : > { %v3256_v39 = vmax.f32 %v1477_v37, 0.0 }
 0x1b3   : > { %1581 = vrot.lane.b32.xlu0 %v3250_v38, %s2727_s28  ;;  %1482 = vrot.lane.b32.xlu1 %v3250_v38, %s2726_s27 }
 0x1b7   : > { %1679 = vrot.lane.b32.xlu0 %v3250_v38, %s2728_s29  ;;  %1484 = vrot.lane.b32.xlu1 %v3256_v39, %s2726_s27  ;;  %s251_s27 = scalar_lea.vmem %s3457_s6, %s2554_s23 }
 0x1b8   : > { %v3262_v40 = vpop.f32.mrb[2].mxu1 }
 0x1b9   : > { %v3264_v41 = vpop.f32.mrb[3].mxu1 }
 0x1bb   : > { %1777 = vrot.lane.b32.xlu0 %v3250_v38, %s2729_s30  ;;  %1583 = vrot.lane.b32.xlu1 %v3256_v39, %s2727_s28 }
 0x1bc   : > { %v3270_v44 = vpop.f32.mrb[4].mxu1 }
 0x1bd   : > { %v3272_v45 = vpop.f32.mrb[5].mxu1 }
 0x1bf   : > { %1965 = vrot.lane.b32.xlu0 %v3250_v38, %s2730_s7  ;;  %1681 = vrot.lane.b32.xlu1 %v3256_v39, %s2728_s29 }
 0x1c3   : > { %2063 = vrot.lane.b32.xlu0 %v3250_v38, %s2732_s9  ;;  %1779 = vrot.lane.b32.xlu1 %v3256_v39, %s2729_s30 }
 0x1c7   : > { %2161 = vrot.lane.b32.xlu0 %v3250_v38, %s2731_s8  ;;  %1967 = vrot.lane.b32.xlu1 %v3256_v39, %s2730_s7 }
 0x1cb   : > { %2259 = vrot.lane.b32.xlu0 %v3250_v38, %s2733_s10  ;;  %2065 = vrot.lane.b32.xlu1 %v3256_v39, %s2732_s9 }
 0x1cf   : > { %2358 = vperm.xlu0 %2715, %v2354_v46   ;;  %2163 = vrot.lane.b32.xlu1 %v3256_v39, %s2731_s8  ;;  %v2537_v46 = vld [vmem:[%s3454_s3 + $0x58] sm:$0x1] }
 0x1d3   : > { %2261 = vrot.lane.b32.xlu1 %v3256_v39, %s2733_s10 }
 0x1d7   : > { %2363 = vperm.xlu1 %2716, %v2355_v47  }
 0x225   : > { %v1483_v49 = vpop.permute.xlu1 %1482  ;;  %v1582_v50 = vpop.permute.xlu0 %1581 }
 0x229   : > { %v1485_v51 = vpop.permute.xlu1 %1484  ;;  %v1680_v60 = vpop.permute.xlu0 %1679 }
 0x22a   : > { %v1486_v13 = vsel %vm269_vm0, %v1483_v49, %v1485_v51  ;;  %v1487_v52 = vsel %vm269_vm0, %v1485_v51, %v1483_v49 }
 0x22b   : > { %v1488_v3 = vmul.f32 %v1487_v52, %v2879_v17  ;;  %v1489_v5 = vmul.f32 %v1486_v13, %v2882_v18  ;;  %v1481_v18 = vld [vmem:[%s3454_s3 + $0x8] sm:$0x1] }
 0x22c   : > { %v2541_v52 = vld [vmem:[%s3454_s3 + $0x68] sm:$0x1] }
 0x22d   : > { %1497 = vmatprep.subr.mxu0 %v1489_v5  ;;  %v1584_v57 = vpop.permute.xlu1 %1583  ;;  %v1778_v8 = vpop.permute.xlu0 %1777  ;;  %v2548_v5 = vld [vmem:[%s3454_s3 + $0x80] sm:$0xff] }
 0x22e   : > { %v1585_v58 = vsel %vm408_vm4, %v1582_v50, %v1584_v57  ;;  %v1586_v59 = vsel %vm408_vm4, %v1584_v57, %v1582_v50  ;;  %1498 = vmatpush1.msra.mxu0 %v1488_v3 }
 0x22f   : > { %v1587_v62 = vmul.f32 %v1586_v59, %v2907_v35  ;;  %v1588_v17 = vmul.f32 %v1585_v58, %v2910_v36  ;;  %2518 = vmatmul.mubr.msk.f32.vlgmr.msra.gmra.mrb[2].mxu0 %vm1490_vm12, %v1480_v56  ;;  %v2520_v36 = vld [vmem:[%s3454_s3 + $0x10] sm:$0xff] }
 0x230   : > { %1567 = vmatprep.mubr.f32.mxu0 %v2725_v2 }
 0x231   : > { %1595 = vmatprep.subr.mxu0 %v1588_v17  ;;  %v1682_v63 = vpop.permute.xlu1 %1681  ;;  %v1966_v24 = vpop.permute.xlu0 %1965 }
 0x232   : > { %v1683_v7 = vsel %vm546_vm6, %v1680_v60, %v1682_v63  ;;  %1596 = vmatpush1.msra.mxu0 %v1587_v62  ;;  %v1684_v12 = vsel %vm546_vm6, %v1682_v63, %v1680_v60 }
 0x233   : > { %v1686_v35 = vmul.f32 %v1683_v7, %v2945_v55  ;;  %2519 = vmatmul.mubr.msk.f32.gmra.mrb[4].mxu0 %vm1490_vm12, %v1481_v18  ;;  %v1685_v10 = vmul.f32 %v1684_v12, %v2942_v54  ;;  %v2521_v55 = vld [vmem:[%s3454_s3 + $0x18] sm:$0x1]  ;;  %v2524_v54 = vld [vmem:[%s3454_s3 + $0x20] sm:$0xff] }
 0x234   : > { %1659 = vmatprep.mubr.f32.mxu0 %v2725_v2 }
 0x235   : > { %1693 = vmatprep.subr.mxu0 %v1686_v35  ;;  %v1780_v9 = vpop.permute.xlu1 %1779  ;;  %v2064_v1 = vpop.permute.xlu0 %2063 }
 0x236   : > { %v1781_v14 = vsel %vm684_vm7, %v1778_v8, %v1780_v9  ;;  %v1782_v16 = vsel %vm684_vm7, %v1780_v9, %v1778_v8 }
 0x237   : > { %v1784_v15 = vmul.f32 %v1781_v14, %v2978_v21  ;;  %2522 = vmatmul.mubr.msk.f32.vlgmr.msra.gmra.mrb[2].mxu0 %vm1490_vm12, %v2520_v36  ;;  %v1783_v21 = vmul.f32 %v1782_v16, %v2987_v23  ;;  %v2528_v23 = vld [vmem:[%s3454_s3 + $0x30] sm:$0xff] }
 0x238   : > { %1694 = vmatpush1.msra.mxu0 %v1685_v10  ;;  %1665 = vmatprep.mubr.f32.mxu0 %v2725_v2 }
 0x239   : > { %1791 = vmatprep.subr.mxu0 %v1784_v15  ;;  %v1968_v19 = vpop.permute.xlu1 %1967  ;;  %v2162_v34 = vpop.permute.xlu0 %2161 }
 0x23a   : > { %v1970_v29 = vsel %vm930_vm8, %v1968_v19, %v1966_v24  ;;  %v1969_v4 = vsel %vm930_vm8, %v1966_v24, %v1968_v19 }
 0x23b   : > { %2523 = vmatmul.mubr.msk.f32.gmra.mrb[4].mxu0 %vm1490_vm12, %v2521_v55  ;;  %v1972_v20 = vmul.f32 %v1970_v29, %v3032_v48  ;;  %v1971_v30 = vmul.f32 %v1969_v4, %v3098_v25 }
 0x23c   : > { %1757 = vmatprep.mubr.f32.mxu0 %v2725_v2 }
 0x23d   : > { %v2066_v28 = vpop.permute.xlu1 %2065  ;;  %v2260_v49 = vpop.permute.xlu0 %2259 }
 0x23e   : > { %v2068_v48 = vsel %vm1068_vm10, %v2066_v28, %v2064_v1  ;;  %v2067_v37 = vsel %vm1068_vm10, %v2064_v1, %v2066_v28 }
 0x23f   : > { %2526 = vmatmul.mubr.msk.f32.vlgmr.msra.gmra.mrb[2].mxu0 %vm1490_vm12, %v2524_v54  ;;  %v2070_v31 = vmul.f32 %v2068_v48, %v3103_v26  ;;  %v2536_v26 = vld [vmem:[%s3454_s3 + $0x50] sm:$0xff] }
 0x240   : > { %1792 = vmatpush1.msra.mxu0 %v1783_v21  ;;  %1763 = vmatprep.mubr.f32.mxu0 %v2725_v2 }
 0x241   : > { %1881 = vmatprep.subr.mxu0 %v3256_v39  ;;  %v2164_v33 = vpop.permute.xlu1 %2163 }
 0x242   : > { %v2166_v25 = vsel %vm1206_vm9, %v2164_v33, %v2162_v34  ;;  %v2165_v50 = vsel %vm1206_vm9, %v2162_v34, %v2164_v33 }
 0x243   : > { %2527 = vmatmul.mubr.msk.f32.gmra.mrb[4].mxu0 %vm1490_vm12, %v2525_v22  ;;  %v2168_v39 = vmul.f32 %v2166_v25, %v3051_v0  ;;  %v2167_v51 = vmul.f32 %v2165_v50, %v3048_v53  ;;  %v2544_v53 = vld [vmem:[%s3454_s3 + $0x70] sm:$0xff] }
 0x244   : > { %1855 = vmatprep.mubr.f32.mxu0 %v2725_v2 }
 0x245   : > { %v2262_v47 = vpop.permute.xlu1 %2261 }
 0x246   : > { %v2264_v0 = vsel %vm1344_vm11, %v2262_v47, %v2260_v49  ;;  %v2263_v3 = vsel %vm1344_vm11, %v2260_v49, %v2262_v47 }
 0x247   : > { %2530 = vmatmul.mubr.msk.f32.vlgmr.msra.gmra.mrb[2].mxu0 %vm1490_vm12, %v2528_v23  ;;  %v2266_v13 = vmul.f32 %v2264_v0, %v3141_v43  ;;  %v2265_v43 = vmul.f32 %v2263_v3, %v3138_v42  ;;  %v2549_v42 = vld [vmem:[%s3454_s3 + $0x88] sm:$0x1] }
 0x248   : > { %1882 = vmatpush1.msra.mxu0 %v3250_v38  ;;  %1861 = vmatprep.mubr.f32.mxu0 %v2725_v2  ;;  %v2069_v38 = vmul.f32 %v2067_v37, %v3169_v61  ;;  %v2540_v61 = vld [vmem:[%s3454_s3 + $0x60] sm:$0xff] }
 0x249   : > { %1979 = vmatprep.subr.mxu0 %v1972_v20 }
 0x24b   : > { %2531 = vmatmul.mubr.msk.f32.gmra.mrb[4].mxu0 %vm1490_vm12, %v2529_v27 }
 0x24c   : > { %1945 = vmatprep.mubr.f32.mxu0 %v2725_v2 }
 0x24e   : > { %v2359_v59 = vpop.permute.xlu0 %2358 }
 0x24f   : > { %2534 = vmatmul.mubr.msk.f32.vlgmr.msra.gmra.mrb[2].mxu0 %vm1490_vm12, %v2532_v6 }
 0x250   : > { %1980 = vmatpush1.msra.mxu0 %v1971_v30  ;;  %1951 = vmatprep.mubr.f32.mxu0 %v2725_v2 }
 0x251   : > { %2077 = vmatprep.subr.mxu0 %v2070_v31 }
 0x253   : > { %2535 = vmatmul.mubr.msk.f32.gmra.mrb[4].mxu0 %vm1490_vm12, %v2533_v32 }
 0x254   : > { %2043 = vmatprep.mubr.f32.mxu0 %v2725_v2 }
 0x256   : > { %v2364_v18 = vpop.permute.xlu1 %2363 }
 0x257   : > { %2538 = vmatmul.mubr.msk.f32.vlgmr.msra.gmra.mrb[2].mxu0 %vm1490_vm12, %v2536_v26 }
 0x258   : > { %2078 = vmatpush1.msra.mxu0 %v2069_v38  ;;  %2049 = vmatprep.mubr.f32.mxu0 %v2725_v2 }
 0x259   : > { %2175 = vmatprep.subr.mxu0 %v2168_v39 }
 0x25b   : > { %2539 = vmatmul.mubr.msk.f32.gmra.mrb[4].mxu0 %vm1490_vm12, %v2537_v46 }
 0x25c   : > { %2141 = vmatprep.mubr.f32.mxu0 %v2725_v2 }
 0x25f   : > { %2542 = vmatmul.mubr.msk.f32.vlgmr.msra.gmra.mrb[2].mxu0 %vm1490_vm12, %v2540_v61 }
 0x260   : > { %2176 = vmatpush1.msra.mxu0 %v2167_v51  ;;  %2147 = vmatprep.mubr.f32.mxu0 %v2725_v2 }
 0x261   : > { %2273 = vmatprep.subr.mxu0 %v2266_v13 }
 0x263   : > { %2543 = vmatmul.mubr.msk.f32.gmra.mrb[4].mxu0 %vm1490_vm12, %v2541_v52 }
 0x264   : > { %2239 = vmatprep.mubr.f32.mxu0 %v2725_v2 }
 0x267   : > { %2546 = vmatmul.mubr.msk.f32.vlgmr.msra.gmra.mrb[2].mxu0 %vm1490_vm12, %v2544_v53 }
 0x268   : > { %2274 = vmatpush1.msra.mxu0 %v2265_v43  ;;  %2245 = vmatprep.mubr.f32.mxu0 %v2725_v2 }
 0x26b   : > { %2547 = vmatmul.mubr.msk.f32.gmra.mrb[4].mxu0 %vm1490_vm12, %v2545_v11 }
 0x26c   : > { %2337 = vmatprep.mubr.f32.mxu0 %v2725_v2 }
 0x26f   : > { %2550 = vmatmul.mubr.msk.f32.vlgmr.msra.gmra.mrb[2].mxu0 %vm1490_vm12, %v2548_v5 }
 0x270   : > { %2343 = vmatprep.mubr.f32.mxu0 %v2725_v2 }
 0x273   : > { %2551 = vmatmul.mubr.msk.f32.gmra.mrb[4].mxu0 %vm1490_vm12, %v2549_v42 }
 0x342   : > { %v2339_v56 = vpop.f32.mrb[2].mxu0 }
 0x343   : > { %v2614_v57 = vadd.f32 %v2339_v56, %v3262_v40  ;;  %v2341_v58 = vpop.f32.mrb[3].mxu0 }
 0x344   : > { %v2615_v60 = vadd.f32 %v2341_v58, %v3264_v41 }
 0x345   : > { %v2366_v62 = vadd.f32 %v2614_v57, %v2359_v59 }
 0x346   : > { %v2367_v2 = vadd.f32 %v2615_v60, %v2359_v59  ;;  %v2345_v17 = vpop.f32.mrb[4].mxu0 }
 0x347   : > { %v2370_v63 = vmax.f32 %v2366_v62, 0.0  ;;  %v2616_v7 = vadd.f32 %v2345_v17, %v3270_v44  ;;  %v2347_v12 = vpop.f32.mrb[5].mxu0 }
 0x348   : > { %v2371_v35 = vmax.f32 %v2367_v2, 0.0  ;;  %v2617_v40 = vadd.f32 %v2347_v12, %v3272_v45 }
 0x349   : > { %2374 = vst [vmem:[%s251_s27] sm:$0xff] %v2370_v63  ;;  %v2368_v36 = vadd.f32 %v2616_v7, %v2364_v18 }
 0x34a   : > { %2375 = vst [vmem:[%s251_s27 + $0x8] sm:$0xff] %v2371_v35  ;;  %v2369_v41 = vadd.f32 %v2617_v40, %v2364_v18 }
 0x34b   : > { %v2372_v8 = vmax.f32 %v2368_v36, 0.0 }
 0x34c   : > { %v2373_v9 = vmax.f32 %v2369_v41, 0.0 }
 0x34d   : > { %2376 = vst [vmem:[%s251_s27 + $0x10] sm:$0x1] %v2372_v8 }
 0x34e   : > { %2377 = vst [vmem:[%s251_s27 + $0x18] sm:$0x1] %v2373_v9 }
 0x34f PF: > { %s16_s21 = sadd.s32 1, %s2723_s21  }
 0x350   : > { %p13_p4 = scmp.ge.s32.totalorder %s16_s21, 4  }
 0x352   :  { %15 = sbr.rel (!%p13_p4) target bundleno = 1 (0x1), region = 97 }

</bundles_post_ra>
